<compile_context>
chip_gen: v6e
topology: v6e:2x2x1
jax: 0.10.0
libtpu: 0.0.40
codegen_flags: <defaults>
</compile_context>

<pallas_src>
import jax
import jax.numpy as jnp
from jax.experimental import pallas as pl
from jax.experimental.pallas import tpu as pltpu


# ----------------------------------------------------------------------------
# Kernels
# ----------------------------------------------------------------------------
def _node_pe_kernel(x_ref, pe_ref, wn_ref, bn_ref, wp_ref, bp_ref, o_ref):
    # x_ref  : [TM, Fn]   node-feature row tile
    # pe_ref : [TM, Fp]   positional-encoding row tile (same rows)
    # wn_ref : [Fn, Hn]   bn_ref : [1, Hn]
    # wp_ref : [Fp, Hp]   bp_ref : [1, Hp]
    # o_ref  : [TM, Hn+Hp]  -> o[:, :Hn] = x@Wn+bn ; o[:, Hn:] = pe@Wpe+bpe
    hn = wn_ref.shape[1]
    node = jnp.dot(x_ref[...], wn_ref[...],
                   preferred_element_type=jnp.float32) + bn_ref[...]
    pe = jnp.dot(pe_ref[...], wp_ref[...],
                 preferred_element_type=jnp.float32) + bp_ref[...]
    # Static lane-range stores into the VMEM tile; the HBM writeback of the
    # full [TM, H] tile stays one lane-dense DMA.
    o_ref[:, :hn] = node.astype(o_ref.dtype)
    o_ref[:, hn:] = pe.astype(o_ref.dtype)


def _linear_kernel(x_ref, w_ref, b_ref, o_ref):
    # o = x @ W + b  (edge encoder)
    o_ref[...] = (jnp.dot(x_ref[...], w_ref[...],
                          preferred_element_type=jnp.float32)
                  + b_ref[...]).astype(o_ref.dtype)


# ----------------------------------------------------------------------------
# pallas_call wrappers (no HBM prework: raw arrays in, final arrays out)
# ----------------------------------------------------------------------------
def _encode_node_pe(x, pe, w_node, b_node, w_pe, b_pe, out_dtype, row_tile):
    n, fn = x.shape
    _, fp = pe.shape
    hn = w_node.shape[1]
    hp = w_pe.shape[1]
    h = hn + hp
    grid = (pl.cdiv(n, row_tile),)
    return pl.pallas_call(
        _node_pe_kernel,
        out_shape=jax.ShapeDtypeStruct((n, h), out_dtype),
        grid=grid,
        in_specs=[
            pl.BlockSpec((row_tile, fn), lambda i: (i, 0)),   # streamed rows
            pl.BlockSpec((row_tile, fp), lambda i: (i, 0)),   # streamed rows
            pl.BlockSpec((fn, hn), lambda i: (0, 0)),         # VMEM-resident
            pl.BlockSpec((1, hn), lambda i: (0, 0)),
            pl.BlockSpec((fp, hp), lambda i: (0, 0)),
            pl.BlockSpec((1, hp), lambda i: (0, 0)),
        ],
        out_specs=pl.BlockSpec((row_tile, h), lambda i: (i, 0)),
        compiler_params=pltpu.CompilerParams(
            dimension_semantics=("parallel",)),
    )(x, pe, w_node, b_node, w_pe, b_pe)


def _encode_edge(x, w, b, out_dtype, row_tile):
    e, fe = x.shape
    h = w.shape[1]
    grid = (pl.cdiv(e, row_tile),)
    return pl.pallas_call(
        _linear_kernel,
        out_shape=jax.ShapeDtypeStruct((e, h), out_dtype),
        grid=grid,
        in_specs=[
            pl.BlockSpec((row_tile, fe), lambda i: (i, 0)),   # streamed rows
            pl.BlockSpec((fe, h), lambda i: (0, 0)),          # VMEM-resident
            pl.BlockSpec((1, h), lambda i: (0, 0)),
        ],
        out_specs=pl.BlockSpec((row_tile, h), lambda i: (i, 0)),
        compiler_params=pltpu.CompilerParams(
            dimension_semantics=("parallel",)),
    )(x, w, b)


def feature_encoder(batch, params, dim_hidden, *, row_tile=1024,
                    out_dtype=None):
    """Pallas version of FeatureEncoder.forward(batch).

    `batch` holds 'x' (node features), 'pe' (positional encodings) and
    'edge_attr' (edge features).  Returns the batch with encoded features.
    Set out_dtype=jnp.bfloat16 to halve the dominant HBM write traffic.
    """
    assert row_tile % 8 == 0, "row_tile must be a multiple of 8 (sublanes)"

    x_node, x_pe, x_edge = batch["x"], batch["pe"], batch["edge_attr"]
    if out_dtype is None:
        out_dtype = x_node.dtype

    node_out = _encode_node_pe(x_node, x_pe,
                               params["w_node"], params["b_node"],
                               params["w_pe"], params["b_pe"],
                               out_dtype, row_tile)
    edge_out = _encode_edge(x_edge, params["w_edge"], params["b_edge"],
                            out_dtype, row_tile)

    assert node_out.shape[1] == dim_hidden
    assert edge_out.shape[1] == dim_hidden

    out_batch = dict(batch)
    out_batch["x"] = node_out
    out_batch["edge_attr"] = edge_out
    # TODO(synk): if the caller immediately copies these into a larger batch
    # struct, wire input_output_aliases / write directly into that buffer to
    # skip one more full-size HBM round trip.
    return out_batch


# ----------------------------------------------------------------------------
# Main
# ----------------------------------------------------------------------------
if __name__ == "__main__":
    # Small, module-consistent sizes.  dim_hidden is a multiple of 128 so the
    # output writeback is lane-dense.
    dim_hidden = 128            # cfg.gt.dim_hidden
    dim_pe = 16                 # cfg.posenc_*.dim_pe
    dim_node_out = dim_hidden - dim_pe
    node_feat = 16
    pe_in = 8
    edge_feat = 16
    num_nodes = 300
    num_edges = 500
    row_tile = 256              # tiny demo tile; use ~1024-2048 at scale

    key = jax.random.PRNGKey(0)
    ks = jax.random.split(key, 8)

    batch = {
        "x": jax.random.normal(ks[0], (num_nodes, node_feat), jnp.float32),
        "pe": jax.random.normal(ks[1], (num_nodes, pe_in), jnp.float32),
        "edge_attr": jax.random.normal(ks[2], (num_edges, edge_feat),
                                       jnp.float32),
    }
    params = {
        "w_node": jax.random.normal(ks[3], (node_feat, dim_node_out),
                                    jnp.float32) * 0.1,
        "b_node": jax.random.normal(ks[4], (1, dim_node_out),
                                    jnp.float32) * 0.1,
        "w_pe": jax.random.normal(ks[5], (pe_in, dim_pe), jnp.float32) * 0.1,
        "b_pe": jax.random.normal(ks[6], (1, dim_pe), jnp.float32) * 0.1,
        "w_edge": jax.random.normal(ks[7], (edge_feat, dim_hidden),
                                    jnp.float32) * 0.1,
        "b_edge": jnp.zeros((1, dim_hidden), jnp.float32),
    }

    # f32 output path (tight reference check).
    out = feature_encoder(batch, params, dim_hidden, row_tile=row_tile)
    jax.block_until_ready(out["x"])
    jax.block_until_ready(out["edge_attr"])

    # Pure-JAX reference (full-f32 precision).
    ref_node = jnp.concatenate(
        [jnp.dot(batch["x"], params["w_node"], precision="highest")
         + params["b_node"],
         jnp.dot(batch["pe"], params["w_pe"], precision="highest")
         + params["b_pe"]], axis=-1)
    ref_edge = (jnp.dot(batch["edge_attr"], params["w_edge"],
                        precision="highest") + params["b_edge"])

    assert out["x"].shape == (num_nodes, dim_hidden)
    assert out["edge_attr"].shape == (num_edges, dim_hidden)
    assert jnp.allclose(out["x"], ref_node, atol=1e-4)
    assert jnp.allclose(out["edge_attr"], ref_edge, atol=1e-4)

    # bf16 output path (halves dominant HBM write traffic); looser tolerance
    # since results are rounded to bf16 on store.
    out_bf = feature_encoder(batch, params, dim_hidden, row_tile=row_tile,
                             out_dtype=jnp.bfloat16)
    jax.block_until_ready(out_bf["x"])
    jax.block_until_ready(out_bf["edge_attr"])
    assert out_bf["x"].dtype == jnp.bfloat16
    assert out_bf["edge_attr"].dtype == jnp.bfloat16
    assert jnp.allclose(out_bf["x"].astype(jnp.float32), ref_node,
                        atol=2e-2, rtol=2e-2)
    assert jnp.allclose(out_bf["edge_attr"].astype(jnp.float32), ref_edge,
                        atol=2e-2, rtol=2e-2)

    # TODO(synk): the original module dispatches encoders from a config-driven
    # registry (AtomEncoder-style embedding lookups, multiple PE encoder
    # variants); only the canonical linear node/PE/edge encoder stack is
    # implemented here.
    print("KERNEL_OK")
</pallas_src>

<mosaic_0001>
module attributes {stable_mosaic.version = 11 : i64} {
  func.func @_node_pe_kernel(%arg0: i32, %arg1: memref<256x16xf32, #tpu.memory_space<vmem>>, %arg2: memref<256x8xf32, #tpu.memory_space<vmem>>, %arg3: memref<16x112xf32, #tpu.memory_space<vmem>>, %arg4: memref<1x112xf32, #tpu.memory_space<vmem>>, %arg5: memref<8x16xf32, #tpu.memory_space<vmem>>, %arg6: memref<1x16xf32, #tpu.memory_space<vmem>>, %arg7: memref<256x128xf32, #tpu.memory_space<vmem>>) attributes {dimension_semantics = [#tpu.dimension_semantics<parallel>], iteration_bounds = array<i64: 2>, scalar_prefetch = 0 : i64, scratch_operands = 0 : i64, tpu.core_type = #tpu.core_type<tc>, window_params = [{transform_indices = @transform_0, window_bounds = array<i64: 256, 16>}, {transform_indices = @transform_1, window_bounds = array<i64: 256, 8>}, {pipeline_mode = #tpu.pipeline_mode<synchronous>, transform_indices = @transform_2, window_bounds = array<i64: 16, 112>}, {pipeline_mode = #tpu.pipeline_mode<synchronous>, transform_indices = @transform_3, window_bounds = array<i64: 1, 112>}, {pipeline_mode = #tpu.pipeline_mode<synchronous>, transform_indices = @transform_4, window_bounds = array<i64: 8, 16>}, {pipeline_mode = #tpu.pipeline_mode<synchronous>, transform_indices = @transform_5, window_bounds = array<i64: 1, 16>}, {transform_indices = @transform_6, window_bounds = array<i64: 256, 128>}]} {
    %c0 = arith.constant 0 : index
    %c0_0 = arith.constant 0 : index
    %0 = vector.load %arg1[%c0, %c0_0] : memref<256x16xf32, #tpu.memory_space<vmem>>, vector<256x16xf32>
    %c0_1 = arith.constant 0 : index
    %c0_2 = arith.constant 0 : index
    %1 = vector.load %arg3[%c0_1, %c0_2] : memref<16x112xf32, #tpu.memory_space<vmem>>, vector<16x112xf32>
    %cst = arith.constant dense<0.000000e+00> : vector<256x112xf32>
    %2 = tpu.matmul %0, %1, %cst {dimension_numbers = #tpu.dot_dimension_numbers<[1], [0], [0], [1], [0, 0, 1, 1], [], []>} : vector<256x16xf32>, vector<16x112xf32>, vector<256x112xf32> -> vector<256x112xf32>
    %c0_3 = arith.constant 0 : index
    %c0_4 = arith.constant 0 : index
    %3 = vector.load %arg4[%c0_3, %c0_4] : memref<1x112xf32, #tpu.memory_space<vmem>>, vector<1x112xf32>
    %4 = vector.broadcast %3 : vector<1x112xf32> to vector<256x112xf32>
    %5 = arith.addf %2, %4 : vector<256x112xf32>
    %c0_5 = arith.constant 0 : index
    %c0_6 = arith.constant 0 : index
    %6 = vector.load %arg2[%c0_5, %c0_6] : memref<256x8xf32, #tpu.memory_space<vmem>>, vector<256x8xf32>
    %c0_7 = arith.constant 0 : index
    %c0_8 = arith.constant 0 : index
    %7 = vector.load %arg5[%c0_7, %c0_8] : memref<8x16xf32, #tpu.memory_space<vmem>>, vector<8x16xf32>
    %cst_9 = arith.constant dense<0.000000e+00> : vector<256x16xf32>
    %8 = tpu.matmul %6, %7, %cst_9 {dimension_numbers = #tpu.dot_dimension_numbers<[1], [0], [0], [1], [0, 0, 1, 1], [], []>} : vector<256x8xf32>, vector<8x16xf32>, vector<256x16xf32> -> vector<256x16xf32>
    %c0_10 = arith.constant 0 : index
    %c0_11 = arith.constant 0 : index
    %9 = vector.load %arg6[%c0_10, %c0_11] : memref<1x16xf32, #tpu.memory_space<vmem>>, vector<1x16xf32>
    %10 = vector.broadcast %9 : vector<1x16xf32> to vector<256x16xf32>
    %11 = arith.addf %8, %10 : vector<256x16xf32>
    %c0_12 = arith.constant 0 : index
    %c0_13 = arith.constant 0 : index
    %12 = vector.load %arg7[%c0_12, %c0_13] : memref<256x128xf32, #tpu.memory_space<vmem>>, vector<256x112xf32>
    tpu.vector_store %arg7[%c0_12, %c0_13], %5 {strides = array<i32>} : memref<256x128xf32, #tpu.memory_space<vmem>>, vector<256x112xf32>,
    %c0_14 = arith.constant 0 : index
    %c112 = arith.constant 112 : index
    %13 = vector.load %arg7[%c0_14, %c112] : memref<256x128xf32, #tpu.memory_space<vmem>>, vector<256x16xf32>
    tpu.vector_store %arg7[%c0_14, %c112], %11 {strides = array<i32>} : memref<256x128xf32, #tpu.memory_space<vmem>>, vector<256x16xf32>,
    return
  }
  func.func @transform_0(%arg0: i32) -> (i32, i32) {
    %c0_i32 = arith.constant 0 : i32
    %c0_i32_0 = arith.constant 0 : i32
    return %arg0, %c0_i32 : i32, i32
  }
  func.func @transform_1(%arg0: i32) -> (i32, i32) {
    %c0_i32 = arith.constant 0 : i32
    %c0_i32_0 = arith.constant 0 : i32
    return %arg0, %c0_i32 : i32, i32
  }
  func.func @transform_2(%arg0: i32) -> (i32, i32) {
    %c0_i32 = arith.constant 0 : i32
    %c0_i32_0 = arith.constant 0 : i32
    %c0_i32_1 = arith.constant 0 : i32
    return %c0_i32, %c0_i32_0 : i32, i32
  }
  func.func @transform_3(%arg0: i32) -> (i32, i32) {
    %c0_i32 = arith.constant 0 : i32
    %c0_i32_0 = arith.constant 0 : i32
    %c0_i32_1 = arith.constant 0 : i32
    return %c0_i32, %c0_i32_0 : i32, i32
  }
  func.func @transform_4(%arg0: i32) -> (i32, i32) {
    %c0_i32 = arith.constant 0 : i32
    %c0_i32_0 = arith.constant 0 : i32
    %c0_i32_1 = arith.constant 0 : i32
    return %c0_i32, %c0_i32_0 : i32, i32
  }
  func.func @transform_5(%arg0: i32) -> (i32, i32) {
    %c0_i32 = arith.constant 0 : i32
    %c0_i32_0 = arith.constant 0 : i32
    %c0_i32_1 = arith.constant 0 : i32
    return %c0_i32, %c0_i32_0 : i32, i32
  }
  func.func @transform_6(%arg0: i32) -> (i32, i32) {
    %c0_i32 = arith.constant 0 : i32
    %c0_i32_0 = arith.constant 0 : i32
    return %arg0, %c0_i32 : i32, i32
  }
}

</mosaic_0001>

<bundles_post_ra>
// kernel: tpu_custom_call.1
= control target key start
LH: loop header
LB: loop body
LE: loop exit
PB: predicated region body
PF: predicated region fallthrough
CT: control target
= control target key end

     0   :  { %11 = vsyncpa [#allocation3], 0  ;;  %s2229_s0 = inlined_call_operand.vmem [shape: f32[300,16], index: 0, kind: input, shape index: {}]   ;;  %s2230_s1 = inlined_call_operand.vmem [shape: f32[300,8], index: 1, kind: input, shape index: {}]   ;;  %s2231_s2 = inlined_call_operand.vmem [shape: f32[16,112], index: 2, kind: input, shape index: {}]   ;;  %s2232_s3 = inlined_call_operand.vmem [shape: f32[1,112], index: 3, kind: input, shape index: {}]   ;;  %s2233_s4 = inlined_call_operand.vmem [shape: f32[8,16], index: 4, kind: input, shape index: {}]   ;;  %s2234_s5 = inlined_call_operand.vmem [shape: f32[1,16], index: 5, kind: input, shape index: {}]   ;;  %s2235_s6 = inlined_call_operand.hbm [shape: f32[300,128], index: 6, kind: output, shape index: {}]  }
   0x1   :  { %13 = vsyncpa [#allocation3 + $0x1], 0  ;;  %s1728_s21 = smov 0   ;;  %s1730_s22 = smov 0  }
   0x2   :  { %s1732_s23 = smov 0   ;;  %s1734_s24 = smov 0  }
   0x3 LB: > { %s1749_s25 = sadd.s32 4294967295, %s1687_s24   ;;  %s1332_s26 = sadd.s32 4294967294, %s1687_s24   ;;  %s1687_s24 = sphi %s1734_s24, %s2241_s24   ;;  %s1683_s23 = sphi %s1732_s23, %s2240_s23   ;;  %s1679_s22 = sphi %s1730_s22, %s2239_s22   ;;  %s1675_s21 = sphi %s1728_s21, %s2238_s21  }
   0x4   : > { %s1753_s27 = sadd.s32 1, %s1687_s24   ;;  %s162_s28 = sadd.s32 1, %s1683_s23 }
   0x5   : > { %s159_s29 = ssub.s32 %s1687_s24, %s1753_s27  ;;  %p172_p0 = scmp.ne.s32.totalorder %s1683_s23, %s1679_s22 }
   0x6   : > { %p160_p1 = scmp.eq.s32.totalorder %s159_s29, 0  ;;  %p173_p2 = scmp.eq.s32.totalorder %s1749_s25, 1 }
   0x7   : > { %p178_p3 = scmp.ne.s32.totalorder %s1679_s22, %s1675_s21  ;;  %p179_p4 = scmp.eq.s32.totalorder %s1332_s26, 1 }
   0x8   : > { %s1764_s30 = scalar_select %p160_p1, %s1683_s23, %s162_s28  }
   0x9   : > { %p1766_p5 = por %p173_p2, %p172_p0  ;;  %p1770_p6 = por %p179_p4, %p178_p3 }
   0xa   : > { %p1335_p7 = scmp.ge.s32.totalorder %s1687_s24, 1  ;;  %p243_p8 = scmp.lt.s32.totalorder %s1687_s24, 3 }
   0xc   : > { %p244_p9 = pnand %p1335_p7, %p243_p8 }
   0xd   : > { %s1780_s11 = sshll.u32 (!%p244_p9), %s1749_s25, 5  ;;  %s1689_s12 = smov (!%p244_p9), 112  }
   0xe   : > { %247 = sbr.rel (%p244_p9) target bundleno = 427 (0x1ab), region = 44  ;;  %p291_p10 = scmp.lt.s32.totalorder (!%p244_p9), %s1780_s11, 37 }
   0xf   : > { %s283_s13 = sand.u32 (!%p244_p9), 1, %s1679_s22  }
  0x10   : > { %s1336_s14 = sshll.u32 (!%p244_p9), %s283_s13, 8  ;;  %s2169_s18 = scalar_lea.sflag (!%p244_p9), [#allocation3], %s283_s13 }
  0x13   : > { %v714_v0 = vld [vmem:[%s2233_s4] sm:$0xff]  ;;  %v352_v1 = vld [vmem:[%s2231_s2 + $0x8] sm:$0xff]  ;;  %s292_s16 = scalar_select %p291_p10, %s1780_s11, 37  ;;  %vm722_vm0 = vcmask 64512   ;;  %vm360_vm1 = vcmask 130048   ;;  %vm1044_vm2 = vcmask 916480  }
  0x14   : > { %v351_v2 = vld [vmem:[%s2231_s2] sm:$0xff]  ;;  %1536 = vmatprep.subr.mxu1 %v714_v0  ;;  %1484 = vmatprep.subr.mxu0 %v352_v1  ;;  %vm1205_vm3 = vcmask 1048448   ;;  %s1247_s19 = ssub.s32 (%p1766_p5), 38, %s1780_s11 }
  0x15   : > { %1537 = vmatpush3.msra.mxu1 %v714_v0  ;;  %1485 = vmatpush3.msra.mxu0 %v352_v1  ;;  %s1338_s17 = sshll.u32 %s292_s16, 3  ;;  %p1248_p11 = scmp.lt.s32.totalorder (%p1766_p5), %s1247_s19, 32 }
  0x16   : > { %1486 = vmatprep.subr.mxu0 %v351_v2  ;;  %s1793_s20 = scalar_lea.vmem %s2230_s1, %s1338_s17  ;;  %s1809_s29 = scalar_lea.vmem %s2229_s0, %s1338_s17 }
  0x17   : > { %1487 = vmatpush3.msra.mxu0 %v351_v2  ;;  %v682_v3 = vld [vmem:[%s1793_s20] sm:$0xff]  ;;  %v683_v4 = vld [vmem:[%s1793_s20 + $0x8] sm:$0xff]  ;;  %v684_v5 = vld [vmem:[%s1793_s20 + $0x10] sm:$0xff]  ;;  %s1953_s17 = scalar_lea.vmem [#allocation2], %s1336_s14 }
  0x18   : > { %1538 = vmatprep.mubr.msk.f32.mxu1 %vm722_vm0, %v682_v3  ;;  %v685_v6 = vld [vmem:[%s1793_s20 + $0x18] sm:$0xff]  ;;  %v686_v7 = vld [vmem:[%s1793_s20 + $0x20] sm:$0xff]  ;;  %v687_v8 = vld [vmem:[%s1793_s20 + $0x28] sm:$0xff] }
  0x19   : > { %1539 = vmatmul.mubr.msk.f32.vlgmr.msra.gmra.mxu1 %vm722_vm0, %v683_v4  ;;  %v688_v9 = vld [vmem:[%s1793_s20 + $0x30] sm:$0xff]  ;;  %v319_v10 = vld [vmem:[%s1809_s29] sm:$0xff]  ;;  %v689_v11 = vld [vmem:[%s1793_s20 + $0x38] sm:$0xff] }
  0x1a   : > { %1541 = vmatprep.mubr.msk.f32.mxu1 %vm722_vm0, %v684_v5  ;;  %1488 = vmatprep.mubr.msk.f32.mxu0 %vm360_vm1, %v319_v10  ;;  %v320_v12 = vld [vmem:[%s1809_s29 + $0x8] sm:$0xff]  ;;  %v321_v13 = vld [vmem:[%s1809_s29 + $0x10] sm:$0xff]  ;;  %v690_v14 = vld [vmem:[%s1793_s20 + $0x40] sm:$0xff] }
  0x1b   : > { %1489 = vmatmul.mubr.msk.f32.vlgmr.msra.gmra.mxu0 %vm360_vm1, %v320_v12  ;;  %v322_v15 = vld [vmem:[%s1809_s29 + $0x18] sm:$0xff]  ;;  %v323_v16 = vld [vmem:[%s1809_s29 + $0x20] sm:$0xff]  ;;  %v691_v17 = vld [vmem:[%s1793_s20 + $0x48] sm:$0xff] }
  0x1c   : > { %1491 = vmatprep.mubr.msk.f32.mxu0 %vm360_vm1, %v321_v13  ;;  %v692_v18 = vld [vmem:[%s1793_s20 + $0x50] sm:$0xff]  ;;  %v324_v19 = vld [vmem:[%s1809_s29 + $0x28] sm:$0xff]  ;;  %v693_v21 = vld [vmem:[%s1793_s20 + $0x58] sm:$0xff] }
  0x1d   : > { %1542 = vmatmul.mubr.msk.f32.gmra.mxu1 %vm722_vm0, %v685_v6  ;;  %v325_v20 = vld [vmem:[%s1809_s29 + $0x30] sm:$0xff]  ;;  %v694_v22 = vld [vmem:[%s1793_s20 + $0x60] sm:$0xff]  ;;  %v326_v23 = vld [vmem:[%s1809_s29 + $0x38] sm:$0xff] }
  0x1e   : > { %1544 = vmatprep.mubr.msk.f32.mxu1 %vm722_vm0, %v686_v7  ;;  %v327_v24 = vld [vmem:[%s1809_s29 + $0x40] sm:$0xff]  ;;  %v695_v25 = vld [vmem:[%s1793_s20 + $0x68] sm:$0xff]  ;;  %v696_v26 = vld [vmem:[%s1793_s20 + $0x70] sm:$0xff] }
  0x1f   : > { %1492 = vmatmul.mubr.msk.f32.gmra.mxu0 %vm360_vm1, %v322_v15  ;;  %v328_v27 = vld [vmem:[%s1809_s29 + $0x48] sm:$0xff]  ;;  %v329_v28 = vld [vmem:[%s1809_s29 + $0x50] sm:$0xff]  ;;  %v697_v29 = vld [vmem:[%s1793_s20 + $0x78] sm:$0xff] }
  0x20   : > { %1494 = vmatprep.mubr.msk.f32.mxu0 %vm360_vm1, %v323_v16  ;;  %v698_v30 = vld [vmem:[%s1793_s20 + $0x80] sm:$0xff]  ;;  %v330_v31 = vld [vmem:[%s1809_s29 + $0x58] sm:$0xff]  ;;  %v699_v33 = vld [vmem:[%s1793_s20 + $0x88] sm:$0xff] }
  0x21   : > { %1545 = vmatmul.mubr.msk.f32.gmra.mxu1 %vm722_vm0, %v687_v8  ;;  %v331_v32 = vld [vmem:[%s1809_s29 + $0x60] sm:$0xff]  ;;  %v700_v34 = vld [vmem:[%s1793_s20 + $0x90] sm:$0xff]  ;;  %v332_v35 = vld [vmem:[%s1809_s29 + $0x68] sm:$0xff] }
  0x22   : > { %1547 = vmatprep.mubr.msk.f32.mxu1 %vm722_vm0, %v688_v9  ;;  %v333_v36 = vld [vmem:[%s1809_s29 + $0x70] sm:$0xff]  ;;  %v701_v37 = vld [vmem:[%s1793_s20 + $0x98] sm:$0xff]  ;;  %v702_v38 = vld [vmem:[%s1793_s20 + $0xa0] sm:$0xff] }
  0x23   : > { %1495 = vmatmul.mubr.msk.f32.gmra.mxu0 %vm360_vm1, %v324_v19  ;;  %v334_v39 = vld [vmem:[%s1809_s29 + $0x78] sm:$0xff]  ;;  %v335_v40 = vld [vmem:[%s1809_s29 + $0x80] sm:$0xff]  ;;  %v703_v41 = vld [vmem:[%s1793_s20 + $0xa8] sm:$0xff] }
  0x24   : > { %1497 = vmatprep.mubr.msk.f32.mxu0 %vm360_vm1, %v325_v20  ;;  %v704_v42 = vld [vmem:[%s1793_s20 + $0xb0] sm:$0xff]  ;;  %v336_v43 = vld [vmem:[%s1809_s29 + $0x88] sm:$0xff]  ;;  %v705_v45 = vld [vmem:[%s1793_s20 + $0xb8] sm:$0xff] }
  0x25   : > { %1548 = vmatmul.mubr.msk.f32.gmra.mxu1 %vm722_vm0, %v689_v11  ;;  %v337_v44 = vld [vmem:[%s1809_s29 + $0x90] sm:$0xff]  ;;  %v706_v46 = vld [vmem:[%s1793_s20 + $0xc0] sm:$0xff]  ;;  %v338_v47 = vld [vmem:[%s1809_s29 + $0x98] sm:$0xff] }
  0x26   : > { %1550 = vmatprep.mubr.msk.f32.mxu1 %vm722_vm0, %v690_v14  ;;  %v339_v48 = vld [vmem:[%s1809_s29 + $0xa0] sm:$0xff]  ;;  %v707_v49 = vld [vmem:[%s1793_s20 + $0xc8] sm:$0xff]  ;;  %v708_v50 = vld [vmem:[%s1793_s20 + $0xd0] sm:$0xff] }
  0x27   : > { %1498 = vmatmul.mubr.msk.f32.gmra.mxu0 %vm360_vm1, %v326_v23  ;;  %v340_v51 = vld [vmem:[%s1809_s29 + $0xa8] sm:$0xff]  ;;  %v341_v52 = vld [vmem:[%s1809_s29 + $0xb0] sm:$0xff]  ;;  %v709_v53 = vld [vmem:[%s1793_s20 + $0xd8] sm:$0xff] }
  0x28   : > { %1500 = vmatprep.mubr.msk.f32.mxu0 %vm360_vm1, %v327_v24  ;;  %v710_v54 = vld [vmem:[%s1793_s20 + $0xe0] sm:$0xff]  ;;  %v342_v55 = vld [vmem:[%s1809_s29 + $0xb8] sm:$0xff]  ;;  %v711_v57 = vld [vmem:[%s1793_s20 + $0xe8] sm:$0xff] }
  0x29   : > { %1551 = vmatmul.mubr.msk.f32.gmra.mxu1 %vm722_vm0, %v691_v17  ;;  %v343_v56 = vld [vmem:[%s1809_s29 + $0xc0] sm:$0xff]  ;;  %v712_v58 = vld [vmem:[%s1793_s20 + $0xf0] sm:$0xff]  ;;  %v344_v59 = vld [vmem:[%s1809_s29 + $0xc8] sm:$0xff] }
  0x2a   : > { %1553 = vmatprep.mubr.msk.f32.mxu1 %vm722_vm0, %v692_v18  ;;  %v345_v60 = vld [vmem:[%s1809_s29 + $0xd0] sm:$0xff]  ;;  %v713_v61 = vld [vmem:[%s1793_s20 + $0xf8] sm:$0xff]  ;;  %v347_v63 = vld [vmem:[%s1809_s29 + $0xe0] sm:$0xff] }
  0x2b   : > { %1501 = vmatmul.mubr.msk.f32.gmra.mxu0 %vm360_vm1, %v328_v27  ;;  %v346_v62 = vld [vmem:[%s1809_s29 + $0xd8] sm:$0xff]  ;;  %v348_v0 = vld [vmem:[%s1809_s29 + $0xe8] sm:$0xff]  ;;  %v349_v1 = vld [vmem:[%s1809_s29 + $0xf0] sm:$0xff] }
  0x2c   : > { %1503 = vmatprep.mubr.msk.f32.mxu0 %vm360_vm1, %v329_v28  ;;  %v350_v2 = vld [vmem:[%s1809_s29 + $0xf8] sm:$0xff]  ;;  %v1931_v3 = vld [vmem:[%s2234_s5] ss:$0 sm:$0xff] }
  0x2d   : > { %1554 = vmatmul.mubr.msk.f32.gmra.mxu1 %vm722_vm0, %v693_v21  ;;  %v1945_v12 = vld [vmem:[%s2232_s3] ss:$0 sm:$0xff] }
  0x2e   : > { %1556 = vmatprep.mubr.msk.f32.mxu1 %vm722_vm0, %v694_v22 }
  0x2f   : > { %1504 = vmatmul.mubr.msk.f32.gmra.mxu0 %vm360_vm1, %v330_v31 }
  0x30   : > { %1506 = vmatprep.mubr.msk.f32.mxu0 %vm360_vm1, %v331_v32 }
  0x31   : > { %1557 = vmatmul.mubr.msk.f32.gmra.mxu1 %vm722_vm0, %v695_v25 }
  0x32   : > { %1559 = vmatprep.mubr.msk.f32.mxu1 %vm722_vm0, %v696_v26 }
  0x33   : > { %1507 = vmatmul.mubr.msk.f32.gmra.mxu0 %vm360_vm1, %v332_v35 }
  0x34   : > { %1509 = vmatprep.mubr.msk.f32.mxu0 %vm360_vm1, %v333_v36 }
  0x35   : > { %1560 = vmatmul.mubr.msk.f32.gmra.mxu1 %vm722_vm0, %v697_v29 }
  0x36   : > { %1562 = vmatprep.mubr.msk.f32.mxu1 %vm722_vm0, %v698_v30 }
  0x37   : > { %1510 = vmatmul.mubr.msk.f32.gmra.mxu0 %vm360_vm1, %v334_v39 }
  0x38   : > { %1512 = vmatprep.mubr.msk.f32.mxu0 %vm360_vm1, %v335_v40 }
  0x39   : > { %1563 = vmatmul.mubr.msk.f32.gmra.mxu1 %vm722_vm0, %v699_v33 }
  0x3a   : > { %1565 = vmatprep.mubr.msk.f32.mxu1 %vm722_vm0, %v700_v34 }
  0x3b   : > { %1513 = vmatmul.mubr.msk.f32.gmra.mxu0 %vm360_vm1, %v336_v43 }
  0x3c   : > { %1515 = vmatprep.mubr.msk.f32.mxu0 %vm360_vm1, %v337_v44 }
  0x3d   : > { %1566 = vmatmul.mubr.msk.f32.gmra.mxu1 %vm722_vm0, %v701_v37 }
  0x3e   : > { %1568 = vmatprep.mubr.msk.f32.mxu1 %vm722_vm0, %v702_v38 }
  0x3f   : > { %1516 = vmatmul.mubr.msk.f32.gmra.mxu0 %vm360_vm1, %v338_v47 }
  0x40   : > { %1518 = vmatprep.mubr.msk.f32.mxu0 %vm360_vm1, %v339_v48 }
  0x41   : > { %1569 = vmatmul.mubr.msk.f32.gmra.mxu1 %vm722_vm0, %v703_v41 }
  0x42   : > { %1571 = vmatprep.mubr.msk.f32.mxu1 %vm722_vm0, %v704_v42 }
  0x43   : > { %1519 = vmatmul.mubr.msk.f32.gmra.mxu0 %vm360_vm1, %v340_v51 }
  0x44   : > { %1521 = vmatprep.mubr.msk.f32.mxu0 %vm360_vm1, %v341_v52 }
  0x45   : > { %1572 = vmatmul.mubr.msk.f32.gmra.mxu1 %vm722_vm0, %v705_v45 }
  0x46   : > { %1574 = vmatprep.mubr.msk.f32.mxu1 %vm722_vm0, %v706_v46 }
  0x47   : > { %1522 = vmatmul.mubr.msk.f32.gmra.mxu0 %vm360_vm1, %v342_v55 }
  0x48   : > { %1524 = vmatprep.mubr.msk.f32.mxu0 %vm360_vm1, %v343_v56 }
  0x49   : > { %1575 = vmatmul.mubr.msk.f32.gmra.mxu1 %vm722_vm0, %v707_v49 }
  0x4a   : > { %1577 = vmatprep.mubr.msk.f32.mxu1 %vm722_vm0, %v708_v50 }
  0x4b   : > { %1525 = vmatmul.mubr.msk.f32.gmra.mxu0 %vm360_vm1, %v344_v59 }
  0x4c   : > { %1527 = vmatprep.mubr.msk.f32.mxu0 %vm360_vm1, %v345_v60 }
  0x4d   : > { %1578 = vmatmul.mubr.msk.f32.gmra.mxu1 %vm722_vm0, %v709_v53 }
  0x4e   : > { %1580 = vmatprep.mubr.msk.f32.mxu1 %vm722_vm0, %v710_v54 }
  0x4f   : > { %1528 = vmatmul.mubr.msk.f32.gmra.mxu0 %vm360_vm1, %v346_v62 }
  0x50   : > { %1530 = vmatprep.mubr.msk.f32.mxu0 %vm360_vm1, %v347_v63 }
  0x51   : > { %1581 = vmatmul.mubr.msk.f32.gmra.mxu1 %vm722_vm0, %v711_v57 }
  0x52   : > { %1583 = vmatprep.mubr.msk.f32.mxu1 %vm722_vm0, %v712_v58 }
  0x53   : > { %1531 = vmatmul.mubr.msk.f32.gmra.mxu0 %vm360_vm1, %v348_v0 }
  0x54   : > { %1533 = vmatprep.mubr.msk.f32.mxu0 %vm360_vm1, %v349_v1 }
  0x55   : > { %1584 = vmatmul.mubr.msk.f32.gmra.mxu1 %vm722_vm0, %v713_v61 }
  0x57   : > { %1534 = vmatmul.mubr.msk.f32.gmra.mxu0 %vm360_vm1, %v350_v2 }
  0xd9   : > { %v1540_v4 = vpop.f32.mrf.mxu1 }
  0xda   : > { %v891_v5 = vadd.f32 %v1540_v4, %v1931_v3 }
  0xdb   : > { %v885_v6 = vpop.f32.mrf.mxu1  ;;  %v1490_v15 = vpop.f32.mrf.mxu0 }
  0xdc   : > { %1111 = vrot.lane.b32.xlu0 %v891_v5, %s1689_s12  ;;  %v886_v8 = vadd.f32 %v1931_v3, %v885_v6  ;;  %v529_v17 = vadd.f32 %v1490_v15, %v1945_v12 }
  0xdd   : > { %v1543_v7 = vpop.f32.mrf.mxu1  ;;  %v523_v19 = vpop.f32.mrf.mxu0 }
  0xde   : > { %v901_v9 = vadd.f32 %v1543_v7, %v1931_v3  ;;  %1046 = vst.msk [vmem:[%s1953_s17 + $0x8] sm:$0xff] %vm1044_vm2, %v529_v17  ;;  %v524_v21 = vadd.f32 %v1945_v12, %v523_v19 }
  0xdf   : > { %v895_v10 = vpop.f32.mrf.mxu1  ;;  %v1493_v23 = vpop.f32.mrf.mxu0 }
  0xe0   : > { %1115 = vrot.lane.b32.xlu1 %v901_v9, %s1689_s12  ;;  %1109 = vrot.lane.b32.xlu0 %v886_v8, %s1689_s12  ;;  %v896_v13 = vadd.f32 %v1931_v3, %v895_v10  ;;  %1045 = vst.msk [vmem:[%s1953_s17] sm:$0xff] %vm1044_vm2, %v524_v21  ;;  %v539_v25 = vadd.f32 %v1493_v23, %v1945_v12 }
  0xe1   : > { %v1546_v11 = vpop.f32.mrf.mxu1  ;;  %v533_v27 = vpop.f32.mrf.mxu0 }
  0xe2   : > { %v911_v20 = vadd.f32 %v1546_v11, %v1931_v3  ;;  %1048 = vst.msk [vmem:[%s1953_s17 + $0x18] sm:$0xff] %vm1044_vm2, %v539_v25  ;;  %v534_v29 = vadd.f32 %v1945_v12, %v533_v27 }
  0xe3   : > { %v905_v14 = vpop.f32.mrf.mxu1  ;;  %v1496_v31 = vpop.f32.mrf.mxu0 }
  0xe4   : > { %v906_v16 = vadd.f32 %v1931_v3, %v905_v14  ;;  %1113 = vrot.lane.b32.xlu1 %v896_v13, %s1689_s12  ;;  %1047 = vst.msk [vmem:[%s1953_s17 + $0x10] sm:$0xff] %vm1044_vm2, %v534_v29  ;;  %v549_v33 = vadd.f32 %v1496_v31, %v1945_v12 }
  0xe5   : > { %v1549_v18 = vpop.f32.mrf.mxu1  ;;  %v543_v35 = vpop.f32.mrf.mxu0 }
  0xe6   : > { %1117 = vrot.lane.b32.xlu0 %v906_v16, %s1689_s12  ;;  %v921_v28 = vadd.f32 %v1549_v18, %v1931_v3  ;;  %1050 = vst.msk [vmem:[%s1953_s17 + $0x28] sm:$0xff] %vm1044_vm2, %v549_v33  ;;  %v544_v37 = vadd.f32 %v1945_v12, %v543_v35 }
  0xe7   : > { %v915_v22 = vpop.f32.mrf.mxu1  ;;  %v1499_v39 = vpop.f32.mrf.mxu0 }
  0xe8   : > { %v916_v24 = vadd.f32 %v1931_v3, %v915_v22  ;;  %1119 = vrot.lane.b32.xlu1 %v911_v20, %s1689_s12  ;;  %1049 = vst.msk [vmem:[%s1953_s17 + $0x20] sm:$0xff] %vm1044_vm2, %v544_v37  ;;  %v559_v41 = vadd.f32 %v1499_v39, %v1945_v12 }
  0xe9   : > { %v1552_v26 = vpop.f32.mrf.mxu1  ;;  %v553_v43 = vpop.f32.mrf.mxu0 }
  0xea   : > { %1121 = vrot.lane.b32.xlu0 %v916_v24, %s1689_s12  ;;  %v931_v36 = vadd.f32 %v1552_v26, %v1931_v3  ;;  %1052 = vst.msk [vmem:[%s1953_s17 + $0x38] sm:$0xff] %vm1044_vm2, %v559_v41  ;;  %v554_v45 = vadd.f32 %v1945_v12, %v553_v43 }
  0xeb   : > { %v925_v30 = vpop.f32.mrf.mxu1  ;;  %v1502_v47 = vpop.f32.mrf.mxu0 }
  0xec   : > { %v926_v32 = vadd.f32 %v1931_v3, %v925_v30  ;;  %1123 = vrot.lane.b32.xlu1 %v921_v28, %s1689_s12  ;;  %1051 = vst.msk [vmem:[%s1953_s17 + $0x30] sm:$0xff] %vm1044_vm2, %v554_v45  ;;  %v569_v49 = vadd.f32 %v1502_v47, %v1945_v12 }
  0xed   : > { %v1555_v34 = vpop.f32.mrf.mxu1  ;;  %v563_v51 = vpop.f32.mrf.mxu0 }
  0xee   : > { %1125 = vrot.lane.b32.xlu0 %v926_v32, %s1689_s12  ;;  %v941_v44 = vadd.f32 %v1555_v34, %v1931_v3  ;;  %1054 = vst.msk [vmem:[%s1953_s17 + $0x48] sm:$0xff] %vm1044_vm2, %v569_v49  ;;  %v564_v53 = vadd.f32 %v1945_v12, %v563_v51 }
  0xef   : > { %v935_v38 = vpop.f32.mrf.mxu1  ;;  %v1505_v55 = vpop.f32.mrf.mxu0 }
  0xf0   : > { %v936_v40 = vadd.f32 %v1931_v3, %v935_v38  ;;  %1127 = vrot.lane.b32.xlu1 %v931_v36, %s1689_s12  ;;  %1053 = vst.msk [vmem:[%s1953_s17 + $0x40] sm:$0xff] %vm1044_vm2, %v564_v53  ;;  %v579_v57 = vadd.f32 %v1505_v55, %v1945_v12 }
  0xf1   : > { %v1558_v42 = vpop.f32.mrf.mxu1  ;;  %v573_v59 = vpop.f32.mrf.mxu0 }
  0xf2   : > { %1129 = vrot.lane.b32.xlu0 %v936_v40, %s1689_s12  ;;  %v951_v52 = vadd.f32 %v1558_v42, %v1931_v3  ;;  %1056 = vst.msk [vmem:[%s1953_s17 + $0x58] sm:$0xff] %vm1044_vm2, %v579_v57  ;;  %v574_v61 = vadd.f32 %v1945_v12, %v573_v59 }
  0xf3   : > { %v945_v46 = vpop.f32.mrf.mxu1  ;;  %v1508_v63 = vpop.f32.mrf.mxu0 }
  0xf4   : > { %v946_v48 = vadd.f32 %v1931_v3, %v945_v46  ;;  %1131 = vrot.lane.b32.xlu1 %v941_v44, %s1689_s12  ;;  %1055 = vst.msk [vmem:[%s1953_s17 + $0x50] sm:$0xff] %vm1044_vm2, %v574_v61  ;;  %v589_v1 = vadd.f32 %v1508_v63, %v1945_v12 }
  0xf5   : > { %v1561_v50 = vpop.f32.mrf.mxu1  ;;  %v583_v4 = vpop.f32.mrf.mxu0 }
  0xf6   : > { %1133 = vrot.lane.b32.xlu0 %v946_v48, %s1689_s12  ;;  %v961_v60 = vadd.f32 %v1561_v50, %v1931_v3  ;;  %1058 = vst.msk [vmem:[%s1953_s17 + $0x68] sm:$0xff] %vm1044_vm2, %v589_v1  ;;  %v584_v6 = vadd.f32 %v1945_v12, %v583_v4 }
  0xf7   : > { %v955_v54 = vpop.f32.mrf.mxu1  ;;  %v1511_v8 = vpop.f32.mrf.mxu0 }
  0xf8   : > { %v956_v56 = vadd.f32 %v1931_v3, %v955_v54  ;;  %1135 = vrot.lane.b32.xlu1 %v951_v52, %s1689_s12  ;;  %1057 = vst.msk [vmem:[%s1953_s17 + $0x60] sm:$0xff] %vm1044_vm2, %v584_v6  ;;  %v599_v10 = vadd.f32 %v1511_v8, %v1945_v12 }
  0xf9   : > { %v1564_v58 = vpop.f32.mrf.mxu1  ;;  %v593_v13 = vpop.f32.mrf.mxu0 }
  0xfa   : > { %1137 = vrot.lane.b32.xlu0 %v956_v56, %s1689_s12  ;;  %v971_v5 = vadd.f32 %v1564_v58, %v1931_v3  ;;  %1060 = vst.msk [vmem:[%s1953_s17 + $0x78] sm:$0xff] %vm1044_vm2, %v599_v10  ;;  %v594_v15 = vadd.f32 %v1945_v12, %v593_v13 }
  0xfb   : > { %v965_v62 = vpop.f32.mrf.mxu1  ;;  %v1514_v17 = vpop.f32.mrf.mxu0 }
  0xfc   : > { %v966_v0 = vadd.f32 %v1931_v3, %v965_v62  ;;  %1139 = vrot.lane.b32.xlu1 %v961_v60, %s1689_s12  ;;  %1059 = vst.msk [vmem:[%s1953_s17 + $0x70] sm:$0xff] %vm1044_vm2, %v594_v15  ;;  %v609_v19 = vadd.f32 %v1514_v17, %v1945_v12 }
  0xfd   : > { %v1567_v2 = vpop.f32.mrf.mxu1  ;;  %v603_v21 = vpop.f32.mrf.mxu0 }
  0xfe   : > { %1141 = vrot.lane.b32.xlu0 %v966_v0, %s1689_s12  ;;  %v981_v14 = vadd.f32 %v1567_v2, %v1931_v3  ;;  %1062 = vst.msk [vmem:[%s1953_s17 + $0x88] sm:$0xff] %vm1044_vm2, %v609_v19  ;;  %v604_v23 = vadd.f32 %v1945_v12, %v603_v21 }
  0xff   : > { %v975_v7 = vpop.f32.mrf.mxu1  ;;  %v1517_v25 = vpop.f32.mrf.mxu0 }
 0x100   : > { %v976_v9 = vadd.f32 %v1931_v3, %v975_v7  ;;  %1143 = vrot.lane.b32.xlu1 %v971_v5, %s1689_s12  ;;  %1061 = vst.msk [vmem:[%s1953_s17 + $0x80] sm:$0xff] %vm1044_vm2, %v604_v23  ;;  %v619_v27 = vadd.f32 %v1517_v25, %v1945_v12 }
 0x101   : > { %v1570_v11 = vpop.f32.mrf.mxu1  ;;  %v613_v29 = vpop.f32.mrf.mxu0 }
 0x102   : > { %1145 = vrot.lane.b32.xlu0 %v976_v9, %s1689_s12  ;;  %v991_v22 = vadd.f32 %v1570_v11, %v1931_v3  ;;  %1064 = vst.msk [vmem:[%s1953_s17 + $0x98] sm:$0xff] %vm1044_vm2, %v619_v27  ;;  %v614_v31 = vadd.f32 %v1945_v12, %v613_v29 }
 0x103   : > { %v985_v16 = vpop.f32.mrf.mxu1  ;;  %v1520_v33 = vpop.f32.mrf.mxu0 }
 0x104   : > { %v986_v18 = vadd.f32 %v1931_v3, %v985_v16  ;;  %1147 = vrot.lane.b32.xlu1 %v981_v14, %s1689_s12  ;;  %1063 = vst.msk [vmem:[%s1953_s17 + $0x90] sm:$0xff] %vm1044_vm2, %v614_v31  ;;  %v629_v35 = vadd.f32 %v1520_v33, %v1945_v12 }
 0x105   : > { %v1573_v20 = vpop.f32.mrf.mxu1  ;;  %v623_v37 = vpop.f32.mrf.mxu0 }
 0x106   : > { %1149 = vrot.lane.b32.xlu0 %v986_v18, %s1689_s12  ;;  %v1001_v30 = vadd.f32 %v1573_v20, %v1931_v3  ;;  %1066 = vst.msk [vmem:[%s1953_s17 + $0xa8] sm:$0xff] %vm1044_vm2, %v629_v35  ;;  %v624_v39 = vadd.f32 %v1945_v12, %v623_v37 }
 0x107   : > { %v995_v24 = vpop.f32.mrf.mxu1  ;;  %v1523_v41 = vpop.f32.mrf.mxu0 }
 0x108   : > { %v996_v26 = vadd.f32 %v1931_v3, %v995_v24  ;;  %1151 = vrot.lane.b32.xlu1 %v991_v22, %s1689_s12  ;;  %1065 = vst.msk [vmem:[%s1953_s17 + $0xa0] sm:$0xff] %vm1044_vm2, %v624_v39  ;;  %v639_v43 = vadd.f32 %v1523_v41, %v1945_v12 }
 0x109   : > { %v1576_v28 = vpop.f32.mrf.mxu1  ;;  %v633_v45 = vpop.f32.mrf.mxu0 }
 0x10a   : > { %1153 = vrot.lane.b32.xlu0 %v996_v26, %s1689_s12  ;;  %v1011_v38 = vadd.f32 %v1576_v28, %v1931_v3  ;;  %1068 = vst.msk [vmem:[%s1953_s17 + $0xb8] sm:$0xff] %vm1044_vm2, %v639_v43  ;;  %v634_v47 = vadd.f32 %v1945_v12, %v633_v45 }
 0x10b   : > { %v1005_v32 = vpop.f32.mrf.mxu1  ;;  %v1526_v49 = vpop.f32.mrf.mxu0 }
 0x10c   : > { %v1006_v34 = vadd.f32 %v1931_v3, %v1005_v32  ;;  %1155 = vrot.lane.b32.xlu1 %v1001_v30, %s1689_s12  ;;  %1067 = vst.msk [vmem:[%s1953_s17 + $0xb0] sm:$0xff] %vm1044_vm2, %v634_v47  ;;  %v649_v51 = vadd.f32 %v1526_v49, %v1945_v12 }
 0x10d   : > { %v1579_v36 = vpop.f32.mrf.mxu1  ;;  %v643_v53 = vpop.f32.mrf.mxu0 }
 0x10e   : > { %1157 = vrot.lane.b32.xlu0 %v1006_v34, %s1689_s12  ;;  %v1021_v46 = vadd.f32 %v1579_v36, %v1931_v3  ;;  %1070 = vst.msk [vmem:[%s1953_s17 + $0xc8] sm:$0xff] %vm1044_vm2, %v649_v51  ;;  %v644_v55 = vadd.f32 %v1945_v12, %v643_v53 }
 0x10f   : > { %v1015_v40 = vpop.f32.mrf.mxu1  ;;  %v1529_v57 = vpop.f32.mrf.mxu0 }
 0x110   : > { %v1016_v42 = vadd.f32 %v1931_v3, %v1015_v40  ;;  %1159 = vrot.lane.b32.xlu1 %v1011_v38, %s1689_s12  ;;  %1069 = vst.msk [vmem:[%s1953_s17 + $0xc0] sm:$0xff] %vm1044_vm2, %v644_v55  ;;  %v659_v59 = vadd.f32 %v1529_v57, %v1945_v12 }
 0x111   : > { %v1582_v44 = vpop.f32.mrf.mxu1  ;;  %v653_v60 = vpop.f32.mrf.mxu0 }
 0x112   : > { %1161 = vrot.lane.b32.xlu0 %v1016_v42, %s1689_s12  ;;  %v1031_v54 = vadd.f32 %v1582_v44, %v1931_v3  ;;  %1072 = vst.msk [vmem:[%s1953_s17 + $0xd8] sm:$0xff] %vm1044_vm2, %v659_v59  ;;  %v654_v62 = vadd.f32 %v1945_v12, %v653_v60 }
 0x113   : > { %v1025_v48 = vpop.f32.mrf.mxu1  ;;  %v1532_v63 = vpop.f32.mrf.mxu0 }
 0x114   : > { %v1026_v50 = vadd.f32 %v1931_v3, %v1025_v48  ;;  %1163 = vrot.lane.b32.xlu1 %v1021_v46, %s1689_s12  ;;  %1071 = vst.msk [vmem:[%s1953_s17 + $0xd0] sm:$0xff] %vm1044_vm2, %v654_v62  ;;  %v669_v0 = vadd.f32 %v1532_v63, %v1945_v12 }
 0x115   : > { %v1585_v52 = vpop.f32.mrf.mxu1  ;;  %v663_v1 = vpop.f32.mrf.mxu0 }
 0x116   : > { %1165 = vrot.lane.b32.xlu0 %v1026_v50, %s1689_s12  ;;  %v1041_v61 = vadd.f32 %v1585_v52, %v1931_v3  ;;  %1074 = vst.msk [vmem:[%s1953_s17 + $0xe8] sm:$0xff] %vm1044_vm2, %v669_v0 }
 0x117   : > { %v1035_v56 = vpop.f32.mrf.mxu1  ;;  %v1535_v2 = vpop.f32.mrf.mxu0 }
 0x118   : > { %v1036_v58 = vadd.f32 %v1931_v3, %v1035_v56  ;;  %1167 = vrot.lane.b32.xlu1 %v1031_v54, %s1689_s12  ;;  %v664_v3 = vadd.f32 %v1945_v12, %v663_v1  ;;  %v679_v4 = vadd.f32 %v1535_v2, %v1945_v12 }
 0x119   : > { %v673_v5 = vpop.f32.mrf.mxu0 }
 0x11a   : > { %1169 = vrot.lane.b32.xlu0 %v1036_v58, %s1689_s12  ;;  %1073 = vst.msk [vmem:[%s1953_s17 + $0xe0] sm:$0xff] %vm1044_vm2, %v664_v3  ;;  %1076 = vst.msk [vmem:[%s1953_s17 + $0xf8] sm:$0xff] %vm1044_vm2, %v679_v4  ;;  %v674_v6 = vadd.f32 %v1945_v12, %v673_v5 }
 0x11c   : > { %1171 = vrot.lane.b32.xlu1 %v1041_v61, %s1689_s12  ;;  %1075 = vst.msk [vmem:[%s1953_s17 + $0xf0] sm:$0xff] %vm1044_vm2, %v674_v6 }
 0x14e   : > { %v1112_v7 = vpop.permute.xlu0 %1111 }
 0x14f   : > { %1207 = vst.msk [vmem:[%s1953_s17 + $0x8] sm:$0xff] %vm1205_vm3, %v1112_v7 }
 0x152   : > { %v1116_v8 = vpop.permute.xlu1 %1115  ;;  %v1110_v9 = vpop.permute.xlu0 %1109 }
 0x153   : > { %1209 = vst.msk [vmem:[%s1953_s17 + $0x18] sm:$0xff] %vm1205_vm3, %v1116_v8  ;;  %1206 = vst.msk [vmem:[%s1953_s17] sm:$0xff] %vm1205_vm3, %v1110_v9 }
 0x156   : > { %v1114_v10 = vpop.permute.xlu1 %1113 }
 0x157   : > { %1208 = vst.msk [vmem:[%s1953_s17 + $0x10] sm:$0xff] %vm1205_vm3, %v1114_v10 }
 0x158   : > { %v1118_v12 = vpop.permute.xlu0 %1117 }
 0x159   : > { %1210 = vst.msk [vmem:[%s1953_s17 + $0x20] sm:$0xff] %vm1205_vm3, %v1118_v12 }
 0x15a   : > { %v1120_v11 = vpop.permute.xlu1 %1119 }
 0x15b   : > { %1211 = vst.msk [vmem:[%s1953_s17 + $0x28] sm:$0xff] %vm1205_vm3, %v1120_v11 }
 0x15c   : > { %v1122_v13 = vpop.permute.xlu0 %1121 }
 0x15d   : > { %1212 = vst.msk [vmem:[%s1953_s17 + $0x30] sm:$0xff] %vm1205_vm3, %v1122_v13 }
 0x15e   : > { %v1124_v14 = vpop.permute.xlu1 %1123 }
 0x15f   : > { %1213 = vst.msk [vmem:[%s1953_s17 + $0x38] sm:$0xff] %vm1205_vm3, %v1124_v14 }
 0x160   : > { %v1126_v15 = vpop.permute.xlu0 %1125 }
 0x161   : > { %1214 = vst.msk [vmem:[%s1953_s17 + $0x40] sm:$0xff] %vm1205_vm3, %v1126_v15 }
 0x162   : > { %v1128_v16 = vpop.permute.xlu1 %1127 }
 0x163   : > { %1215 = vst.msk [vmem:[%s1953_s17 + $0x48] sm:$0xff] %vm1205_vm3, %v1128_v16 }
 0x164   : > { %v1130_v17 = vpop.permute.xlu0 %1129 }
 0x165   : > { %1216 = vst.msk [vmem:[%s1953_s17 + $0x50] sm:$0xff] %vm1205_vm3, %v1130_v17 }
 0x166   : > { %v1132_v18 = vpop.permute.xlu1 %1131 }
 0x167   : > { %1217 = vst.msk [vmem:[%s1953_s17 + $0x58] sm:$0xff] %vm1205_vm3, %v1132_v18 }
 0x168   : > { %v1134_v19 = vpop.permute.xlu0 %1133 }
 0x169   : > { %1218 = vst.msk [vmem:[%s1953_s17 + $0x60] sm:$0xff] %vm1205_vm3, %v1134_v19 }
 0x16a   : > { %v1136_v20 = vpop.permute.xlu1 %1135 }
 0x16b   : > { %1219 = vst.msk [vmem:[%s1953_s17 + $0x68] sm:$0xff] %vm1205_vm3, %v1136_v20 }
 0x16c   : > { %v1138_v21 = vpop.permute.xlu0 %1137 }
 0x16d   : > { %1220 = vst.msk [vmem:[%s1953_s17 + $0x70] sm:$0xff] %vm1205_vm3, %v1138_v21 }
 0x16e   : > { %v1140_v22 = vpop.permute.xlu1 %1139 }
 0x16f   : > { %1221 = vst.msk [vmem:[%s1953_s17 + $0x78] sm:$0xff] %vm1205_vm3, %v1140_v22 }
 0x170   : > { %v1142_v23 = vpop.permute.xlu0 %1141 }
 0x171   : > { %1222 = vst.msk [vmem:[%s1953_s17 + $0x80] sm:$0xff] %vm1205_vm3, %v1142_v23 }
 0x172   : > { %v1144_v24 = vpop.permute.xlu1 %1143 }
 0x173   : > { %1223 = vst.msk [vmem:[%s1953_s17 + $0x88] sm:$0xff] %vm1205_vm3, %v1144_v24 }
 0x174   : > { %v1146_v25 = vpop.permute.xlu0 %1145 }
 0x175   : > { %1224 = vst.msk [vmem:[%s1953_s17 + $0x90] sm:$0xff] %vm1205_vm3, %v1146_v25 }
 0x176   : > { %v1148_v26 = vpop.permute.xlu1 %1147 }
 0x177   : > { %1225 = vst.msk [vmem:[%s1953_s17 + $0x98] sm:$0xff] %vm1205_vm3, %v1148_v26 }
 0x178   : > { %v1150_v27 = vpop.permute.xlu0 %1149 }
 0x179   : > { %1226 = vst.msk [vmem:[%s1953_s17 + $0xa0] sm:$0xff] %vm1205_vm3, %v1150_v27 }
 0x17a   : > { %v1152_v28 = vpop.permute.xlu1 %1151 }
 0x17b   : > { %1227 = vst.msk [vmem:[%s1953_s17 + $0xa8] sm:$0xff] %vm1205_vm3, %v1152_v28 }
 0x17c   : > { %v1154_v29 = vpop.permute.xlu0 %1153 }
 0x17d   : > { %1228 = vst.msk [vmem:[%s1953_s17 + $0xb0] sm:$0xff] %vm1205_vm3, %v1154_v29 }
 0x17e   : > { %v1156_v30 = vpop.permute.xlu1 %1155 }
 0x17f   : > { %1229 = vst.msk [vmem:[%s1953_s17 + $0xb8] sm:$0xff] %vm1205_vm3, %v1156_v30 }
 0x180   : > { %v1158_v31 = vpop.permute.xlu0 %1157 }
 0x181   : > { %1230 = vst.msk [vmem:[%s1953_s17 + $0xc0] sm:$0xff] %vm1205_vm3, %v1158_v31 }
 0x182   : > { %v1160_v32 = vpop.permute.xlu1 %1159 }
 0x183   : > { %1231 = vst.msk [vmem:[%s1953_s17 + $0xc8] sm:$0xff] %vm1205_vm3, %v1160_v32 }
 0x184   : > { %v1162_v33 = vpop.permute.xlu0 %1161 }
 0x185   : > { %1232 = vst.msk [vmem:[%s1953_s17 + $0xd0] sm:$0xff] %vm1205_vm3, %v1162_v33 }
 0x186   : > { %v1164_v34 = vpop.permute.xlu1 %1163 }
 0x187   : > { %1233 = vst.msk [vmem:[%s1953_s17 + $0xd8] sm:$0xff] %vm1205_vm3, %v1164_v34 }
 0x188   : > { %v1166_v35 = vpop.permute.xlu0 %1165 }
 0x189   : > { %1234 = vst.msk [vmem:[%s1953_s17 + $0xe0] sm:$0xff] %vm1205_vm3, %v1166_v35 }
 0x18a   : > { %v1168_v36 = vpop.permute.xlu1 %1167 }
 0x18b   : > { %1235 = vst.msk [vmem:[%s1953_s17 + $0xe8] sm:$0xff] %vm1205_vm3, %v1168_v36  ;;  %1245 = sbr.rel (!%p1766_p5) target bundleno = 427 (0x1ab), region = 48 }
 0x18c   : > { %v1170_v37 = vpop.permute.xlu0 %1169 }
 0x18d   : > { %1236 = vst.msk [vmem:[%s1953_s17 + $0xf0] sm:$0xff] %vm1205_vm3, %v1170_v37 }
 0x18e   : > { %v1172_v38 = vpop.permute.xlu1 %1171 }
 0x18f   : > { %1237 = vst.msk [vmem:[%s1953_s17 + $0xf8] sm:$0xff] %vm1205_vm3, %v1172_v38 }
 0x190   : > { %s2243_s19 = smov (!%p1248_p11, %s1247_s19), 32 }
 0x191   : > { %s2174_s20 = sshll.u32 %s2243_s19, 7 }
 0x192   : > { %s1252_s26 = ssub.s32 4096, %s2174_s20 }
 0x193   : > { %1253 = vsyncadd %s2169_s18, %s1252_s26  ;;  %p1410_p12 = scmp.ne.s32.totalorder %s2174_s20, 0  ;;  %s1416_s28 = sshll.u32 %s1749_s25, 12 }
 0x194   : > { %s2183_s9 = scalar_lea.hbm %s2235_s6, %s1416_s28  ;;  %s1258_s11 = sshll.u32 %s1953_s17, 4  ;;  %s2186_s11 = int_to_ptr.vmem [resolvable:$true] %s1258_s11 }
 0x195   : > { %s1627_s10 = scalar_lea.vmem %s2186_s11, %s2174_s20  ;;  %s1690_s12 = smov [#allocation2]  }
 0x196   : > { %p1628_p13 = scmp.ne.s32.totalorder %s2186_s11, %s1627_s10  ;;  %s1631_s13 = sshll.u32 %s1690_s12, 4  ;;  %s1632_s13 = int_to_ptr.vmem [resolvable:$false] %s1631_s13 }
 0x197   : > { %s1633_s25 = scalar_lea.vmem %s1632_s13, 8192  ;;  %p1634_p2 = scmp.lt.s32.totalorder %s2186_s11, %s1632_s13 }
 0x198   : > { %p1629_p0 = pnand %p1628_p13, %p1410_p12  ;;  %p1635_p3 = scmp.lt.s32.totalorder %s1633_s25, %s1627_s10 }
 0x19a   : > { %p1630_p1 = pneg %p1629_p0  ;;  %p1636_p4 = por %p1635_p3, %p1634_p2 }
 0x19c   : > { %p1637_p5 = pnand %p1636_p4, %p1630_p1 }
 0x19e   : > { %1640 = shalt.err (!%p1637_p5)
}
 0x19f   : > { %s1641_s14 = scalar_lea.hbm %s2183_s9, %s2174_s20  ;;  %s1645_s17 = scalar_lea.hbm %s2235_s6, 4864 }
 0x1a0   : > { %p1642_p7 = scmp.ne.s32.totalorder %s2183_s9, %s1641_s14  ;;  %p1646_p10 = scmp.lt.s32.totalorder %s2183_s9, %s2235_s6 }
 0x1a1   : > { %p1647_p11 = scmp.lt.s32.totalorder %s1645_s17, %s1641_s14 }
 0x1a2   : > { %p1643_p8 = pnand %p1642_p7, %p1410_p12 }
 0x1a3   : > { %p1648_p13 = por %p1647_p11, %p1646_p10 }
 0x1a4   : > { %p1644_p9 = pneg %p1643_p8 }
 0x1a6   : > { %p1649_p0 = pnand %p1648_p13, %p1644_p9 }
 0x1a8   : > { %1652 = shalt.err (!%p1649_p0)
}
 0x1a9   : > { %s1691_s28 = smov 128   ;;  %s1692_s29 = smov 8  }
 0x1aa   : > { %1264 = dma.vmem_to_hbm [thread:$0]  (%p1410_p12), %s2186_s11, %s2174_s20, %s2183_s9, %s2169_s18, %s1691_s28, %s1691_s28, %s1692_s29  }
 0x1ab PF: > { %p1591_p1 = scmp.ge.s32.totalorder %s1687_s24, 2  ;;  %s1273_s7 = sand.u32 1, %s1675_s21  }
 0x1ac   : > { %s1274_s10 = scalar_lea.sflag [#allocation3], %s1273_s7 }
 0x1ad   : > { %p1588_p2 = pnand %p1591_p1, %p1770_p6 }
 0x1af   : > { %p1589_p3 = pneg %p1588_p2 }
 0x1b1   : > { %1670 = dma.done.wait (%p1589_p3), %s1274_s10, 4096  }
 0x1b2   : > { %1672 = vsyncadd (%p1589_p3), %s1274_s10, 4294963200  ;;  %p16_p4 = scmp.ge.s32.totalorder %s1753_s27, 4   ;;  %s2238_s21 = smov %s1679_s22 }
 0x1b3   : > { %s2239_s22 = smov %s1683_s23  ;;  %s2240_s23 = smov %s1764_s30 }
 0x1b4   : > { %s2241_s24 = smov %s1753_s27  ;;  %18 = sbr.rel (!%p16_p4) target bundleno = 3 (0x3), region = 82 }
 0x1b9   :  { %1279 = vsyncpa [#allocation3], 1 }
 0x1ba   :  { %1281 = vsyncpa [#allocation3 + $0x1], 1 }

</bundles_post_ra>
